<compile_context>
chip_gen: v7x
topology: tpu7x:2x2x1
jax: 0.10.0
libtpu: 0.0.40
codegen_flags: <defaults>
</compile_context>

<pallas_src>
import functools

import jax
import jax.numpy as jnp
import numpy as np
from jax import lax
from jax.experimental import pallas as pl
from jax.experimental.pallas import tpu as pltpu


def _ce_kernel(labels_ref, logits_ref, sum_ref, cnt_ref,
               acc_sum, acc_cnt, cls_ids,
               *, ignore_index, hw, tile_p, n_inner):
    p = pl.program_id(1)          # pixel chunk (parallel, for v7x dual-TC)
    i = pl.program_id(2)          # pixel block within chunk (arbitrary)

    c = logits_ref.shape[1]

    @pl.when(i == 0)
    def _():
        acc_sum[...] = jnp.zeros_like(acc_sum)
        acc_cnt[...] = jnp.zeros_like(acc_cnt)
        # Grid-invariant class-index constant, materialised once per chunk.
        cls_ids[...] = lax.broadcasted_iota(jnp.int32, (c, tile_p), 0)

    x = logits_ref[0]             # (C, TILE_P), classes on sublanes, input dtype
    lbl = labels_ref[0]           # (1, TILE_P), int32, lane-dense

    # Numerically stable log-softmax along the class (sublane) axis.
    # max/subtract stay in the input dtype (bf16-capable VPU on v6e/v7x);
    # promote once to f32 for exp-sum, gather and accumulation.
    m = jnp.max(x, axis=0, keepdims=True)                 # (1, TILE_P)
    shifted = (x - m).astype(jnp.float32)                 # (C, TILE_P) f32
    lse = jnp.log(jnp.sum(jnp.exp(shifted), axis=0, keepdims=True))  # (1, TILE_P)

    # Masked-select gather of the labeled shifted logit (no float one-hot,
    # logp never materialised for the full tile).
    gathered = jnp.sum(jnp.where(cls_ids[...] == lbl, shifted, 0.0),
                       axis=0, keepdims=True)             # (1, TILE_P)
    logp_y = gathered - lse                               # (1, TILE_P)

    # Validity: label mask AND global-pixel-index mask (tail block past H*W
    # contains undefined data, so mask by index, not by label value).
    pix = ((p * n_inner + i) * tile_p
           + lax.broadcasted_iota(jnp.int32, (1, tile_p), 1))
    valid = jnp.logical_and(lbl != ignore_index, pix < hw)

    acc_sum[...] += jnp.where(valid, -logp_y, 0.0)
    acc_cnt[...] += jnp.where(valid, 1.0, 0.0)

    @pl.when(i == pl.num_programs(2) - 1)
    def _():
        sum_ref[...] = jnp.sum(acc_sum[...]).reshape(1, 1, 1, 1)
        cnt_ref[...] = jnp.sum(acc_cnt[...]).reshape(1, 1, 1, 1)


def cross_entropy_loss(logits, labels, *, ignore_index=None, tile_p=None):
    """Pallas implementation of CrossEntropyLoss.forward (default weights).

    logits: [N, C, H, W] float (f32 or bf16)
    labels: [N, H, W]    int
    Returns dict {'ce_loss': scalar, 'loss': scalar} matching the PyTorch module.
    """
    # nn.CrossEntropyLoss default ignore_index is -100 (never matches valid labels)
    ii = -100 if ignore_index is None else int(ignore_index)

    n, c, h, w = logits.shape
    hw = h * w
    itemsize = jnp.dtype(logits.dtype).itemsize
    c_pad = -(-c // 8) * 8

    # --- C-aware pixel tile: target ~2 MiB per (C, tile_p) logits block ------
    if tile_p is None:
        tile_p = (2 * 1024 * 1024) // max(c * itemsize, 1)
    tile_p = max(512, min(int(tile_p), 8192))
    tile_p = (tile_p // 128) * 128

    def vmem_needed(tp):
        return (2 * c_pad * tp * itemsize      # double-buffered logits blocks
                + 2 * 8 * tp * 4               # double-buffered label blocks (sublane-padded)
                + c_pad * tp * 4               # class-id scratch
                + 2 * 8 * tp * 4               # f32 accumulators (sublane-padded)
                + 4 * c_pad * tp * 4)          # f32 temporaries estimate

    # 40 MiB working-set budget: safe on v7x (64 MiB physical VMEM per TC),
    # conservative but far from limiting on v5e/v6e (128 MiB).
    budget = 40 * 1024 * 1024
    while tile_p > 512 and vmem_needed(tile_p) > budget:
        tile_p = max(512, ((tile_p // 2) // 128) * 128)

    # Don't over-allocate for tiny images.
    tile_p = max(128, min(tile_p, -(-hw // 128) * 128))

    # Free reshapes of the contiguous NCHW / NHW tensors (no transpose, no pad).
    x = logits.reshape(n, c, hw)
    y = labels.reshape(n, 1, hw).astype(jnp.int32)

    total_blocks = -(-hw // tile_p)
    # Extra "parallel" pixel-chunk axis so both v7x TensorCores are busy even
    # when N is small; harmless on single-TC v5e/v6e.
    n_split = 2 if total_blocks >= 2 else 1
    n_inner = -(-total_blocks // n_split)
    last_blk = total_blocks - 1
    grid = (n, n_split, n_inner)

    def pix_map(b, p, i):
        # Clamp so fully out-of-range blocks (odd block counts) stay in-bounds;
        # their contribution is masked by the global pixel-index check in-kernel.
        return (b, 0, jnp.minimum(p * n_inner + i, last_blk))

    vmem_limit = int(min(max(vmem_needed(tile_p) * 3 // 2 + (2 << 20), 16 << 20),
                         48 << 20))

    kernel = functools.partial(_ce_kernel, ignore_index=ii, hw=hw,
                               tile_p=tile_p, n_inner=n_inner)

    loss_sum, valid_cnt = pl.pallas_call(
        kernel,
        out_shape=(
            jax.ShapeDtypeStruct((n, n_split, 1, 1), jnp.float32),
            jax.ShapeDtypeStruct((n, n_split, 1, 1), jnp.float32),
        ),
        grid=grid,
        in_specs=[
            pl.BlockSpec((1, 1, tile_p), pix_map),   # labels, lane-dense
            pl.BlockSpec((1, c, tile_p), pix_map),   # logits, class-major
        ],
        out_specs=(
            pl.BlockSpec((1, 1, 1, 1), lambda b, p, i: (b, p, 0, 0)),
            pl.BlockSpec((1, 1, 1, 1), lambda b, p, i: (b, p, 0, 0)),
        ),
        scratch_shapes=[
            pltpu.VMEM((1, tile_p), jnp.float32),    # per-lane loss accumulator
            pltpu.VMEM((1, tile_p), jnp.float32),    # per-lane valid-count accumulator
            pltpu.VMEM((c, tile_p), jnp.int32),      # hoisted class-index iota
        ],
        compiler_params=pltpu.CompilerParams(
            dimension_semantics=("parallel", "parallel", "arbitrary"),
            vmem_limit_bytes=vmem_limit,
        ),
    )(y, x)

    ce = jnp.sum(loss_sum) / jnp.sum(valid_cnt)
    return {"ce_loss": ce, "loss": ce}


def _reference(logits, labels, ignore_index):
    ii = -100 if ignore_index is None else int(ignore_index)
    n, c, h, w = logits.shape
    x = jnp.transpose(logits, (0, 2, 3, 1)).reshape(-1, c).astype(jnp.float32)
    y = labels.reshape(-1).astype(jnp.int32)
    logp = jax.nn.log_softmax(x, axis=-1)
    valid = (y != ii)
    y_safe = jnp.where(valid, y, 0)
    picked = jnp.take_along_axis(logp, y_safe[:, None], axis=-1)[:, 0]
    nll = jnp.where(valid, -picked, 0.0)
    return jnp.sum(nll) / jnp.sum(valid.astype(jnp.float32))


if __name__ == "__main__":
    key = jax.random.PRNGKey(0)
    k1, k2, k3, k4, k5 = jax.random.split(key, 5)

    # Case 1: divisible spatial size, with ignore_index.
    N, C, H, W = 2, 4, 16, 16
    ignore_index = 255
    logits = jax.random.normal(k1, (N, C, H, W), dtype=jnp.float32)
    labels = jax.random.randint(k2, (N, H, W), 0, C, dtype=jnp.int32)
    labels = jnp.where(jax.random.bernoulli(k3, 0.1, (N, H, W)),
                       ignore_index, labels)

    out = cross_entropy_loss(logits, labels, ignore_index=ignore_index)
    out = jax.tree_util.tree_map(jax.block_until_ready, out)
    ref = _reference(logits, labels, ignore_index)
    np.testing.assert_allclose(np.asarray(out["ce_loss"]), np.asarray(ref),
                               rtol=1e-5, atol=1e-5)
    np.testing.assert_allclose(np.asarray(out["loss"]), np.asarray(ref),
                               rtol=1e-5, atol=1e-5)

    # Case 2: ragged spatial size (exercises the in-kernel tail mask), no
    # ignore_index (defaults to -100, never matches valid labels).
    N2, C2, H2, W2 = 1, 4, 16, 13
    logits2 = jax.random.normal(k4, (N2, C2, H2, W2), dtype=jnp.float32)
    labels2 = jax.random.randint(k5, (N2, H2, W2), 0, C2, dtype=jnp.int32)

    out2 = cross_entropy_loss(logits2, labels2)
    out2 = jax.tree_util.tree_map(jax.block_until_ready, out2)
    ref2 = _reference(logits2, labels2, None)
    np.testing.assert_allclose(np.asarray(out2["ce_loss"]), np.asarray(ref2),
                               rtol=1e-5, atol=1e-5)

    print("KERNEL_OK")
</pallas_src>

<mosaic_0001>
module attributes {stable_mosaic.version = 11 : i64} {
  func.func @_ce_kernel(%arg0: i32, %arg1: i32, %arg2: i32, %arg3: memref<1x1x256xi32, #tpu.memory_space<vmem>>, %arg4: memref<1x4x256xf32, #tpu.memory_space<vmem>>, %arg5: memref<1x1x1x1xf32, #tpu.memory_space<vmem>>, %arg6: memref<1x1x1x1xf32, #tpu.memory_space<vmem>>, %arg7: memref<1x256xf32, #tpu.memory_space<vmem>>, %arg8: memref<1x256xf32, #tpu.memory_space<vmem>>, %arg9: memref<4x256xi32, #tpu.memory_space<vmem>>) attributes {dimension_semantics = [#tpu.dimension_semantics<parallel>, #tpu.dimension_semantics<parallel>, #tpu.dimension_semantics<arbitrary>], iteration_bounds = array<i64: 2, 1, 1>, scalar_prefetch = 0 : i64, scratch_operands = 3 : i64, tpu.core_type = #tpu.core_type<tc>, window_params = [{transform_indices = @transform_0, window_bounds = array<i64: 1, 1, 256>}, {transform_indices = @transform_1, window_bounds = array<i64: 1, 4, 256>}, {transform_indices = @transform_2, window_bounds = array<i64: 1, 1, 1, 1>}, {transform_indices = @transform_3, window_bounds = array<i64: 1, 1, 1, 1>}]} {
    %c0_i32 = arith.constant 0 : i32
    %0 = arith.cmpi eq, %arg2, %c0_i32 : i32
    %1 = arith.extui %0 : i1 to i32
    %c0_i32_0 = arith.constant 0 : i32
    %2 = arith.cmpi ne, %1, %c0_i32_0 : i32
    scf.if %2 {
      %cst_26 = arith.constant 0.000000e+00 : f32
      %50 = vector.broadcast %cst_26 : f32 to vector<1x256xf32>
      %c0_27 = arith.constant 0 : index
      %c0_28 = arith.constant 0 : index
      %51 = vector.load %arg7[%c0_27, %c0_28] : memref<1x256xf32, #tpu.memory_space<vmem>>, vector<1x256xf32>
      tpu.vector_store %arg7[%c0_27, %c0_28], %50 {strides = array<i32>} : memref<1x256xf32, #tpu.memory_space<vmem>>, vector<1x256xf32>,
      %cst_29 = arith.constant 0.000000e+00 : f32
      %52 = vector.broadcast %cst_29 : f32 to vector<1x256xf32>
      %c0_30 = arith.constant 0 : index
      %c0_31 = arith.constant 0 : index
      %53 = vector.load %arg8[%c0_30, %c0_31] : memref<1x256xf32, #tpu.memory_space<vmem>>, vector<1x256xf32>
      tpu.vector_store %arg8[%c0_30, %c0_31], %52 {strides = array<i32>} : memref<1x256xf32, #tpu.memory_space<vmem>>, vector<1x256xf32>,
      %54 = tpu.iota {dimensions = array<i32: 0>} : vector<4x256xi32>
      %c0_32 = arith.constant 0 : index
      %c0_33 = arith.constant 0 : index
      %55 = vector.load %arg9[%c0_32, %c0_33] : memref<4x256xi32, #tpu.memory_space<vmem>>, vector<4x256xi32>
      tpu.vector_store %arg9[%c0_32, %c0_33], %54 {strides = array<i32>} : memref<4x256xi32, #tpu.memory_space<vmem>>, vector<4x256xi32>,
    } else {
    }
    %c0 = arith.constant 0 : index
    %c0_1 = arith.constant 0 : index
    %c0_2 = arith.constant 0 : index
    %3 = vector.load %arg4[%c0, %c0_1, %c0_2] : memref<1x4x256xf32, #tpu.memory_space<vmem>>, vector<1x4x256xf32>
    %4 = vector.shape_cast %3 : vector<1x4x256xf32> to vector<4x256xf32>
    %c0_3 = arith.constant 0 : index
    %c0_4 = arith.constant 0 : index
    %c0_5 = arith.constant 0 : index
    %5 = vector.load %arg3[%c0_3, %c0_4, %c0_5] : memref<1x1x256xi32, #tpu.memory_space<vmem>>, vector<1x1x256xi32>
    %6 = vector.shape_cast %5 : vector<1x1x256xi32> to vector<1x256xi32>
    %cst = arith.constant dense<0xFF800000> : vector<256xf32>
    %7 = vector.multi_reduction <maximumf>, %4, %cst [0] : vector<4x256xf32> to vector<256xf32>
    %8 = vector.shape_cast %7 : vector<256xf32> to vector<1x256xf32>
    %9 = vector.broadcast %8 : vector<1x256xf32> to vector<4x256xf32>
    %10 = arith.subf %4, %9 : vector<4x256xf32>
    %11 = math.exp %10 : vector<4x256xf32>
    %cst_6 = arith.constant dense<0.000000e+00> : vector<256xf32>
    %12 = vector.multi_reduction <add>, %11, %cst_6 [0] : vector<4x256xf32> to vector<256xf32>
    %13 = vector.shape_cast %12 : vector<256xf32> to vector<1x256xf32>
    %14 = math.log %13 : vector<1x256xf32>
    %c0_7 = arith.constant 0 : index
    %c0_8 = arith.constant 0 : index
    %15 = vector.load %arg9[%c0_7, %c0_8] : memref<4x256xi32, #tpu.memory_space<vmem>>, vector<4x256xi32>
    %16 = vector.broadcast %6 : vector<1x256xi32> to vector<4x256xi32>
    %17 = arith.cmpi eq, %15, %16 : vector<4x256xi32>
    %cst_9 = arith.constant 0.000000e+00 : f32
    %18 = vector.broadcast %cst_9 : f32 to vector<4x256xf32>
    %19 = arith.select %17, %10, %18 : vector<4x256xi1>, vector<4x256xf32>
    %cst_10 = arith.constant dense<0.000000e+00> : vector<256xf32>
    %20 = vector.multi_reduction <add>, %19, %cst_10 [0] : vector<4x256xf32> to vector<256xf32>
    %21 = vector.shape_cast %20 : vector<256xf32> to vector<1x256xf32>
    %22 = arith.subf %21, %14 : vector<1x256xf32>
    %c1_i32 = arith.constant 1 : i32
    %23 = arith.muli %arg1, %c1_i32 : i32
    %24 = arith.addi %23, %arg2 : i32
    %c256_i32 = arith.constant 256 : i32
    %25 = arith.muli %24, %c256_i32 : i32
    %26 = tpu.iota {dimensions = array<i32: 1>} : vector<1x256xi32>
    %27 = vector.broadcast %25 : i32 to vector<1x256xi32>
    %28 = arith.addi %27, %26 : vector<1x256xi32>
    %c255_i32 = arith.constant 255 : i32
    %29 = vector.broadcast %c255_i32 : i32 to vector<1x256xi32>
    %30 = arith.cmpi ne, %6, %29 : vector<1x256xi32>
    %c256_i32_11 = arith.constant 256 : i32
    %31 = vector.broadcast %c256_i32_11 : i32 to vector<1x256xi32>
    %32 = arith.cmpi slt, %28, %31 : vector<1x256xi32>
    %33 = arith.andi %30, %32 : vector<1x256xi1>
    %c0_12 = arith.constant 0 : index
    %c0_13 = arith.constant 0 : index
    %34 = vector.load %arg7[%c0_12, %c0_13] : memref<1x256xf32, #tpu.memory_space<vmem>>, vector<1x256xf32>
    %cst_14 = arith.constant 0.000000e+00 : f32
    %35 = vector.broadcast %cst_14 : f32 to vector<1x256xf32>
    %36 = arith.subf %35, %22 : vector<1x256xf32>
    %cst_15 = arith.constant 0.000000e+00 : f32
    %37 = vector.broadcast %cst_15 : f32 to vector<1x256xf32>
    %38 = arith.select %33, %36, %37 : vector<1x256xi1>, vector<1x256xf32>
    %39 = arith.addf %34, %38 : vector<1x256xf32>
    %c0_16 = arith.constant 0 : index
    %c0_17 = arith.constant 0 : index
    %40 = vector.load %arg7[%c0_16, %c0_17] : memref<1x256xf32, #tpu.memory_space<vmem>>, vector<1x256xf32>
    tpu.vector_store %arg7[%c0_16, %c0_17], %39 {strides = array<i32>} : memref<1x256xf32, #tpu.memory_space<vmem>>, vector<1x256xf32>,
    %c0_18 = arith.constant 0 : index
    %c0_19 = arith.constant 0 : index
    %41 = vector.load %arg8[%c0_18, %c0_19] : memref<1x256xf32, #tpu.memory_space<vmem>>, vector<1x256xf32>
    %cst_20 = arith.constant 1.000000e+00 : f32
    %cst_21 = arith.constant 0.000000e+00 : f32
    %42 = vector.broadcast %cst_20 : f32 to vector<1x256xf32>
    %43 = vector.broadcast %cst_21 : f32 to vector<1x256xf32>
    %44 = arith.select %33, %42, %43 : vector<1x256xi1>, vector<1x256xf32>
    %45 = arith.addf %41, %44 : vector<1x256xf32>
    %c0_22 = arith.constant 0 : index
    %c0_23 = arith.constant 0 : index
    %46 = vector.load %arg8[%c0_22, %c0_23] : memref<1x256xf32, #tpu.memory_space<vmem>>, vector<1x256xf32>
    tpu.vector_store %arg8[%c0_22, %c0_23], %45 {strides = array<i32>} : memref<1x256xf32, #tpu.memory_space<vmem>>, vector<1x256xf32>,
    %c0_i32_24 = arith.constant 0 : i32
    %47 = arith.cmpi eq, %arg2, %c0_i32_24 : i32
    %48 = arith.extui %47 : i1 to i32
    %c0_i32_25 = arith.constant 0 : i32
    %49 = arith.cmpi ne, %48, %c0_i32_25 : i32
    scf.if %49 {
      %c0_26 = arith.constant 0 : index
      %c0_27 = arith.constant 0 : index
      %50 = vector.load %arg7[%c0_26, %c0_27] : memref<1x256xf32, #tpu.memory_space<vmem>>, vector<1x256xf32>
      %51 = vector.shape_cast %50 : vector<1x256xf32> to vector<1x1x256xf32>
      %cst_28 = arith.constant dense<0.000000e+00> : vector<1xf32>
      %52 = vector.multi_reduction <add>, %51, %cst_28 [1, 2] : vector<1x1x256xf32> to vector<1xf32>
      %53 = vector.shape_cast %52 : vector<1xf32> to vector<1x1x1xf32>
      %54 = vector.extract %53[0, 0, 0] : f32 from vector<1x1x1xf32>
      %55 = vector.broadcast %54 : f32 to vector<1x1x1x1xf32>
      %c0_29 = arith.constant 0 : index
      %c0_30 = arith.constant 0 : index
      %c0_31 = arith.constant 0 : index
      %c0_32 = arith.constant 0 : index
      %56 = vector.load %arg5[%c0_29, %c0_30, %c0_31, %c0_32] : memref<1x1x1x1xf32, #tpu.memory_space<vmem>>, vector<1x1x1x1xf32>
      tpu.vector_store %arg5[%c0_29, %c0_30, %c0_31, %c0_32], %55 {strides = array<i32>} : memref<1x1x1x1xf32, #tpu.memory_space<vmem>>, vector<1x1x1x1xf32>,
      %c0_33 = arith.constant 0 : index
      %c0_34 = arith.constant 0 : index
      %57 = vector.load %arg8[%c0_33, %c0_34] : memref<1x256xf32, #tpu.memory_space<vmem>>, vector<1x256xf32>
      %58 = vector.shape_cast %57 : vector<1x256xf32> to vector<1x1x256xf32>
      %cst_35 = arith.constant dense<0.000000e+00> : vector<1xf32>
      %59 = vector.multi_reduction <add>, %58, %cst_35 [1, 2] : vector<1x1x256xf32> to vector<1xf32>
      %60 = vector.shape_cast %59 : vector<1xf32> to vector<1x1x1xf32>
      %61 = vector.extract %60[0, 0, 0] : f32 from vector<1x1x1xf32>
      %62 = vector.broadcast %61 : f32 to vector<1x1x1x1xf32>
      %c0_36 = arith.constant 0 : index
      %c0_37 = arith.constant 0 : index
      %c0_38 = arith.constant 0 : index
      %c0_39 = arith.constant 0 : index
      %63 = vector.load %arg6[%c0_36, %c0_37, %c0_38, %c0_39] : memref<1x1x1x1xf32, #tpu.memory_space<vmem>>, vector<1x1x1x1xf32>
      tpu.vector_store %arg6[%c0_36, %c0_37, %c0_38, %c0_39], %62 {strides = array<i32>} : memref<1x1x1x1xf32, #tpu.memory_space<vmem>>, vector<1x1x1x1xf32>,
    } else {
    }
    return
  }
  func.func @transform_0(%arg0: i32, %arg1: i32, %arg2: i32) -> (i32, i32, i32) {
    %c1_i32 = arith.constant 1 : i32
    %0 = arith.muli %arg1, %c1_i32 : i32
    %1 = arith.addi %0, %arg2 : i32
    %c0_i32 = arith.constant 0 : i32
    %2 = arith.minsi %1, %c0_i32 : i32
    %c0_i32_0 = arith.constant 0 : i32
    %c0_i32_1 = arith.constant 0 : i32
    return %arg0, %c0_i32_0, %2 : i32, i32, i32
  }
  func.func @transform_1(%arg0: i32, %arg1: i32, %arg2: i32) -> (i32, i32, i32) {
    %c1_i32 = arith.constant 1 : i32
    %0 = arith.muli %arg1, %c1_i32 : i32
    %1 = arith.addi %0, %arg2 : i32
    %c0_i32 = arith.constant 0 : i32
    %2 = arith.minsi %1, %c0_i32 : i32
    %c0_i32_0 = arith.constant 0 : i32
    %c0_i32_1 = arith.constant 0 : i32
    return %arg0, %c0_i32_0, %2 : i32, i32, i32
  }
  func.func @transform_2(%arg0: i32, %arg1: i32, %arg2: i32) -> (i32, i32, i32, i32) {
    %c0_i32 = arith.constant 0 : i32
    %c0_i32_0 = arith.constant 0 : i32
    %c0_i32_1 = arith.constant 0 : i32
    return %arg0, %arg1, %c0_i32, %c0_i32_0 : i32, i32, i32, i32
  }
  func.func @transform_3(%arg0: i32, %arg1: i32, %arg2: i32) -> (i32, i32, i32, i32) {
    %c0_i32 = arith.constant 0 : i32
    %c0_i32_0 = arith.constant 0 : i32
    %c0_i32_1 = arith.constant 0 : i32
    return %arg0, %arg1, %c0_i32, %c0_i32_0 : i32, i32, i32, i32
  }
}

</mosaic_0001>

<bundles_post_ra>
// kernel: tpu_custom_call.1
= control target key start
LH: loop header
LB: loop body
LE: loop exit
PB: predicated region body
PF: predicated region fallthrough
CT: control target
= control target key end

     0   :  { %9 = vsyncpa [#allocation6], 0  ;;  %s1108_s0 = inlined_call_operand.hbm [shape: s32[2,1,256], index: 0, kind: input, shape index: {}]   ;;  %s1109_s1 = inlined_call_operand.hbm [shape: f32[2,4,256], index: 1, kind: input, shape index: {}]   ;;  %s1110_s2 = inlined_call_operand.vmem [shape: f32[2,1,1,1], index: 2, kind: output, shape index: {0}]   ;;  %s1111_s3 = inlined_call_operand.vmem [shape: f32[2,1,1,1], index: 3, kind: output, shape index: {1}]  }
   0x1   :  { %11 = vsyncpa [#allocation6 + $0x1], 0 }
   0x2   :  { %12 = vsyncpa [#allocation8], 0 }
   0x3   :  { %14 = vsyncpa [#allocation8 + $0x1], 0  ;;  %s897_s12 = smov 0   ;;  %s899_s13 = smov 0  }
   0x4   :  { %s901_s14 = smov 0   ;;  %s903_s15 = smov 0  }
   0x5   :  { %s905_s16 = smov 0   ;;  %s907_s17 = smov 0  }
   0x6 LB: > { %s663_s18 = sadd.s32 4294967295, %s869_s17   ;;  %s39_s19 = sadd.s32 1, %s865_s16  ;;  %s869_s17 = sphi %s907_s17, %s20_s17   ;;  %s865_s16 = sphi %s905_s16, %s1129_s16   ;;  %s861_s15 = sphi %s903_s15, %s1128_s15   ;;  %s857_s14 = sphi %s901_s14, %s1127_s14   ;;  %s853_s13 = sphi %s899_s13, %s1126_s13   ;;  %s849_s12 = sphi %s897_s12, %s1125_s12  }
   0x7   : > { %p41_p0 = scmp.ge.s32.totalorder %s39_s19, 2  ;;  %s54_s20 = sadd.s32 1, %s857_s14 }
   0x8   : > { %p61_p1 = scmp.ne.s32.totalorder %s857_s14, %s853_s13  ;;  %p62_p2 = scmp.eq.s32.totalorder %s869_s17, 0 }
   0x9   : > { %s1131_s19 = smov (%p41_p0, %s39_s19), 0  ;;  %p67_p4 = scmp.ne.s32.totalorder %s853_s13, %s849_s12 }
   0xa   : > { %p933_p3 = por %p62_p2, %p61_p1  ;;  %s49_s22 = ssub.s32 %s865_s16, %s1131_s19 }
   0xb   : > { %p68_p5 = scmp.eq.s32.totalorder %s663_s18, 0  ;;  %p52_p6 = scmp.eq.s32.totalorder %s49_s22, 0 }
   0xc   : > { %p695_p8 = scmp.lt.s32.totalorder %s869_s17, 2  ;;  %s949_s25 = sand.u32 1, %s857_s14  }
   0xd   : > { %p940_p7 = por %p68_p5, %p67_p4  ;;  %s678_s26 = sshll.u32 %s865_s16, 5 }
   0xe   : > { %s946_s24 = scalar_select %p52_p6, %s857_s14, %s54_s20  }
   0xf   : > { %s1114_s23 = scalar_select %p940_p7, 1, 0 }
  0x10   : > { %s667_s27 = sshll.u32 %s949_s25, 1  ;;  %s956_s30 = scalar_lea.hbm %s1108_s0, %s678_s26 }
  0x11   : > { %s185_s4 = scalar_lea.vmem [#allocation5], %s667_s27  ;;  %p960_p9 = pnand %p695_p8, %p933_p3 }
  0x12   : > { %s198_s5 = sshll.u32 %s185_s4, 4  ;;  %s182_s7 = scalar_lea.sflag [#allocation6], %s949_s25  ;;  %s964_s5 = int_to_ptr.vmem [resolvable:$true] %s198_s5 }
  0x13   : > { %s755_s8 = scalar_lea.hbm %s956_s30, 32  ;;  %p757_p13 = pneg %p960_p9 }
  0x14   : > { %p756_p12 = scmp.ne.s32.totalorder %s956_s30, %s755_s8  ;;  %s760_s11 = scalar_lea.hbm %s1108_s0, 64 }
  0x15   : > { %p761_p2 = scmp.lt.u32.totalorder %s956_s30, %s1108_s0  ;;  %p762_p3 = scmp.lt.u32.totalorder %s760_s11, %s755_s8 }
  0x16   : > { %p758_p0 = pnand %p757_p13, %p756_p12  ;;  %p764_p5 = scmp.lt.u32.totalorder %s755_s8, %s956_s30 }
  0x17   : > { %p763_p4 = por %p762_p3, %p761_p2 }
  0x18   : > { %p759_p1 = pneg %p758_p0 }
  0x19   : > { %p765_p6 = por %p764_p5, %p763_p4 }
  0x1b   : > { %p766_p8 = pnand %p765_p6, %p759_p1 }
  0x1d   : > { %769 = shalt.err (!%p766_p8)
}
  0x1e   : > { %s770_s20 = scalar_lea.vmem %s964_s5, 32  ;;  %s871_s21 = smov [#allocation5]  }
  0x1f   : > { %p771_p12 = scmp.ne.s32.totalorder %s964_s5, %s770_s20  ;;  %s775_s22 = sshll.u32 %s871_s21, 4  ;;  %s776_s22 = int_to_ptr.vmem [resolvable:$false] %s775_s22 }
  0x20   : > { %s777_s26 = scalar_lea.vmem %s776_s22, 64  ;;  %p778_p11 = scmp.lt.s32.totalorder %s964_s5, %s776_s22 }
  0x21   : > { %p773_p0 = pnand %p771_p12, %p757_p13  ;;  %p779_p2 = scmp.lt.s32.totalorder %s777_s26, %s770_s20 }
  0x23   : > { %p774_p10 = pneg %p773_p0  ;;  %p780_p3 = por %p779_p2, %p778_p11 }
  0x25   : > { %p781_p4 = pnand %p780_p3, %p774_p10 }
  0x27   : > { %784 = shalt.err (!%p781_p4)
}
  0x28   : > { %691 = dma.hbm_to_vmem [thread:$0]  (!%p960_p9), %s956_s30, 32, %s964_s5, %s182_s7  }
  0x29   : > { %p1116_p1 = scmp.lt.s32.totalorder %s869_s17, 3  ;;  %p1117_p5 = scmp.ge.s32.totalorder %s869_s17, 1 }
  0x2a   : > { %s670_s28 = sshll.u32 %s949_s25, 3  ;;  %s679_s29 = sshll.u32 %s865_s16, 7 }
  0x2b   : > { %p998_p6 = pnand %p1117_p5, %p1116_p1  ;;  %s1007_s9 = scalar_lea.hbm %s1109_s1, %s679_s29 }
  0x2c   : > { %s209_s10 = scalar_lea.vmem [#allocation7], %s670_s28  ;;  %s206_s30 = scalar_lea.sflag [#allocation8], %s949_s25 }
  0x2d   : > { %s1118_s27 = scalar_select %p998_p6, 1, 0 }
  0x2e   : > { %s222_s11 = sshll.u32 %s209_s10, 4  ;;  %s785_s5 = scalar_lea.hbm %s1007_s9, 128  ;;  %s223_s11 = int_to_ptr.vmem [resolvable:$true] %s222_s11 }
  0x2f   : > { %p786_p10 = scmp.ne.s32.totalorder %s1007_s9, %s785_s5  ;;  %s790_s18 = scalar_lea.hbm %s1109_s1, 256 }
  0x30   : > { %p791_p12 = scmp.lt.u32.totalorder %s1007_s9, %s1109_s1  ;;  %p792_p0 = scmp.lt.u32.totalorder %s790_s18, %s785_s5 }
  0x31   : > { %p788_p11 = pnand %p786_p10, %p757_p13  ;;  %p794_p3 = scmp.lt.u32.totalorder %s785_s5, %s1007_s9 }
  0x32   : > { %p793_p2 = por %p792_p0, %p791_p12 }
  0x33   : > { %p789_p8 = pneg %p788_p11 }
  0x34   : > { %p795_p4 = por %p794_p3, %p793_p2 }
  0x36   : > { %p796_p1 = pnand %p795_p4, %p789_p8 }
  0x38   : > { %799 = shalt.err (!%p796_p1)
}
  0x39   : > { %s800_s25 = scalar_lea.vmem %s223_s11, 128  ;;  %s872_s22 = smov [#allocation7]  }
  0x3a   : > { %p801_p5 = scmp.ne.s32.totalorder %s223_s11, %s800_s25  ;;  %s805_s26 = sshll.u32 %s872_s22, 4  ;;  %s806_s26 = int_to_ptr.vmem [resolvable:$false] %s805_s26 }
  0x3b   : > { %s807_s28 = scalar_lea.vmem %s806_s26, 256  ;;  %p808_p7 = scmp.lt.s32.totalorder %s223_s11, %s806_s26 }
  0x3c   : > { %p803_p10 = pnand %p801_p5, %p757_p13  ;;  %p809_p6 = scmp.lt.s32.totalorder %s807_s28, %s800_s25 }
  0x3e   : > { %p804_p11 = pneg %p803_p10  ;;  %p810_p0 = por %p809_p6, %p808_p7 }
  0x40   : > { %p811_p12 = pnand %p810_p0, %p804_p11 }
  0x42   : > { %814 = shalt.err (!%p811_p12)
}
  0x43   : > { %694 = dma.hbm_to_vmem [thread:$0]  (!%p960_p9), %s1007_s9, 128, %s223_s11, %s206_s30  }
  0x44   : > { %p1119_p8 = scmp.ne.s32.totalorder %s1118_s27, 0 }
  0x45   : > { %s233_s29 = sand.u32 (!%p1119_p8), 1, %s853_s13   ;;  %p1120_p13 = scmp.ne.s32.totalorder (!%p1119_p8), %s1114_s23, 0 }
  0x46   : > { %231 = sbr.rel (%p1119_p8) target bundleno = 378 (0x17a), region = 28  ;;  %s674_s4 = sshll.u32 (!%p1119_p8), %s233_s29, 1 }
  0x47   : > { %s234_s8 = scalar_lea.sflag (!%p1119_p8), [#allocation6], %s233_s29  ;;  %s237_s10 = scalar_lea.vmem (!%p1119_p8), [#allocation5], %s674_s4 }
  0x4d   : > { %840 = dma.done.wait (%p1120_p13), %s234_s8, 32  }
  0x4e   : > { %842 = vsyncadd (%p1120_p13), %s234_s8, 4294967264  ;;  %s675_s5 = sshll.u32 %s233_s29, 3  ;;  %s243_s7 = scalar_lea.sflag [#allocation8], %s233_s29 }
  0x4f   : > { %s246_s6 = scalar_lea.vmem [#allocation7], %s675_s5 }
  0x50   : > { %844 = dma.done.wait (%p1120_p13), %s243_s7, 128  }
  0x51   : > { %846 = vsyncadd (%p1120_p13), %s243_s7, 4294967168  ;;  %v305_v0 = vlaneseq  ;;  %v873_v2 = vmov 1966171168   ;;  %v874_v4 = vmov 0.0   ;;  %vm326_vm1 = vcmask 1043456   ;;  %v321_v10 = vld [vmem:[%s246_s6] sm:$0xff] }
  0x52   : > { %v415_v3 = vunpack.c.l.s4 %v873_v2  ;;  %v875_v7 = vmov 1   ;;  %v324_v11 = vcombine.high %v321_v10, %v321_v10  ;;  %v327_v12 = vsel %vm326_vm1, %v321_v10, -inf  ;;  %v322_v15 = vld [vmem:[%s237_s10] sm:$0x3]  ;;  %p289_p7 = scmp.lt.s32.totalorder %s861_s15, 1 }
  0x53   : > { %vm1040_vm0 = vcmp.lt.s32.totalorder %v305_v0, 256  ;;  %v312_v5 = vshrl.u32 %v305_v0, 7  ;;  %v413_v8 = vcombine.low %v875_v7, %v875_v7  ;;  %v328_v13 = vrot.slane %v327_v12, 4 }
  0x54   : > { %309 = vst.msk [vmem:[#allocation2] sm:$0x3] %vm1040_vm0, %v874_v4  ;;  %310 = vst.msk [vmem:[#allocation3] sm:$0x3] %vm1040_vm0, %v874_v4  ;;  %v416_v6 = vunpack.c.0.s8 %v415_v3  ;;  %v334_v16 = vsel %vm326_vm1, %v324_v11, -inf  ;;  %vm408_vm2 = vcmp.ne.s32.totalorder %v322_v15, 255 }
  0x55   : > { %v329_v17 = vmax.f32 %v327_v12, %v328_v13  ;;  %v335_v18 = vrot.slane %v334_v16, 4  ;;  %v876_v23 = vmov 839922192   ;;  %v1062_v35 = vsub.s32 0, %v312_v5  ;;  %s1133_s15 = smov (!%p289_p7, %s861_s15), 1 }
  0x56   : > { %v1048_v9 = vsub.s32 %v416_v6, %v312_v5  ;;  %v314_v24 = vunpack.c.l.s4 %v876_v23  ;;  %v1064_v36 = vsub.s32 1, %v312_v5  ;;  %vm477_vm6 = vcmask 1040384   ;;  %s294_s9 = scalar_lea.vmem %s1110_s2, %s1133_s15  ;;  %s300_s18 = scalar_lea.vmem %s1111_s3, %s1133_s15 }
  0x57   : > { %v330_v20 = vrot.slane %v329_v17, 2  ;;  %v336_v21 = vmax.f32 %v334_v16, %v335_v18  ;;  %v373_v40 = vrot.slane %v322_v15, %v1062_v35  ;;  %vm491_vm7 = vcmask 0  }
  0x58   : > { %v420_v14 = vrot.slane %v413_v8, %v1048_v9  ;;  %v315_v32 = vunpack.c.0.s8 %v314_v24  ;;  %v377_v41 = vrot.slane %v322_v15, %v1064_v36 }
  0x59   : > { %v331_v26 = vmax.f32 %v329_v17, %v330_v20  ;;  %v337_v27 = vrot.slane %v336_v21, 2 }
  0x5a   : > { %v427_v19 = vrot.slane %v420_v14, %v1048_v9  ;;  %v318_v38 = vsub.s32 %v315_v32, %v312_v5  ;;  %v378_v45 = vcombine.low %v373_v40, %v377_v41 }
  0x5b   : > { %v458_v22 = vld [vmem:[#allocation3] sm:$0x3]  ;;  %v332_v30 = vrot.slane %v331_v26, 1  ;;  %v338_v31 = vmax.f32 %v336_v21, %v337_v27  ;;  %v430_v27 = vld [vmem:[#allocation2] sm:$0x3] }
  0x5c   : > { %vm428_vm3 = vcmp.ne.s32.totalorder %v427_v19, 0  ;;  %v319_v43 = vrot.slane %v312_v5, %v318_v38 }
  0x5d   : > { %vm1054_vm4 = vmand %vm408_vm2, %vm428_vm3  ;;  %v333_v33 = vmax.f32 %v331_v26, %v332_v30  ;;  %v339_v34 = vrot.slane %v338_v31, 1 }
  0x5e   : > { %v459_v28 = vsel %vm1054_vm4, 1.0, %v874_v4  ;;  %vm379_vm5 = vcmp.eq.s32.totalorder %v319_v43, %v378_v45 }
  0x5f   : > { %v460_v29 = vadd.f32 %v459_v28, %v458_v22  ;;  %v340_v37 = vmax.f32 %v338_v31, %v339_v34 }
  0x61   : > { %461 = vst.msk [vmem:[#allocation3] sm:$0x3] %vm1040_vm0, %v460_v29  ;;  %v343_v39 = vcombine.low %v333_v33, %v340_v37 }
  0x63   : > { %v345_v42 = vsub.f32 %v321_v10, %v343_v39 }
  0x65   : > { %v346_v44 = vmul.f32 1.442695, %v345_v42  ;;  %v380_v46 = vsel %vm379_vm5, %v345_v42, 0.0 }
  0x66   : > { %v382_v47 = vcombine.high %v380_v46, %v380_v46  ;;  %v384_v49 = vsel %vm326_vm1, %v380_v46, 0.0 }
  0x67   : > { %749 = vpow2.f32 %v346_v44  ;;  %v385_v55 = vrot.slane %v384_v49, 4 }
  0x68   : > { %v391_v53 = vsel %vm326_vm1, %v382_v47, 0.0  ;;  %v493_v31 = vld [vmem:[#allocation3] sm:$0x3] }
  0x69   : > { %v392_v58 = vrot.slane %v391_v53, 4  ;;  %v386_v61 = vadd.f32 %v385_v55, %v384_v49  ;;  %v498_v32 = vrot.slane %v493_v31, %v1062_v35  ;;  %v502_v33 = vrot.slane %v493_v31, %v1064_v36 }
  0x6b   : > { %v393_v0 = vadd.f32 %v392_v58, %v391_v53  ;;  %v387_v4 = vrot.slane %v386_v61, 2  ;;  %v505_v40 = vsel %vm477_vm6, %v498_v32, 0.0  ;;  %v506_v25 = vsel %vm477_vm6, %v502_v33, 0.0 }
  0x6c   : > { %v507_v42 = vadd.f32 %v506_v25, %v505_v40 }
  0x6d   : > { %v394_v7 = vrot.slane %v393_v0, 2  ;;  %v388_v10 = vadd.f32 %v387_v4, %v386_v61 }
  0x6f   : > { %v395_v11 = vadd.f32 %v394_v7, %v393_v0  ;;  %v389_v12 = vrot.slane %v388_v10, 1 }
  0x71   : > { %v750_v48 = vpop.eup %749  ;;  %v396_v13 = vrot.slane %v395_v11, 1  ;;  %v390_v14 = vadd.f32 %v389_v12, %v388_v10 }
  0x72   : > { %v349_v50 = vcombine.high %v750_v48, %v750_v48  ;;  %v351_v51 = vsel %vm326_vm1, %v750_v48, 0.0 }
  0x73   : > { %v352_v52 = vrot.slane %v351_v51, 4  ;;  %v397_v17 = vadd.f32 %v396_v13, %v395_v11 }
  0x74   : > { %v358_v54 = vsel %vm326_vm1, %v349_v50, 0.0 }
  0x75   : > { %v353_v56 = vadd.f32 %v352_v52, %v351_v51  ;;  %v359_v57 = vrot.slane %v358_v54, 4 }
  0x77   : > { %v354_v59 = vrot.slane %v353_v56, 2  ;;  %v360_v60 = vadd.f32 %v359_v57, %v358_v54 }
  0x79   : > { %v355_v62 = vadd.f32 %v354_v59, %v353_v56  ;;  %v361_v63 = vrot.slane %v360_v60, 2 }
  0x7b   : > { %v356_v2 = vrot.slane %v355_v62, 1  ;;  %v362_v3 = vadd.f32 %v361_v63, %v360_v60 }
  0x7d   : > { %v357_v5 = vadd.f32 %v356_v2, %v355_v62  ;;  %v363_v6 = vrot.slane %v362_v3, 1 }
  0x7f   : > { %v364_v8 = vadd.f32 %v363_v6, %v362_v3  ;;  %751 = vlog2.f32 %v357_v5 }
  0x81   : > { %753 = vlog2.f32 %v364_v8 }
  0x89   : > { %v752_v15 = vpop.eup %751 }
  0x8a   : > { %v366_v16 = vmul.f32 0.6931472, %v752_v15 }
  0x8b   : > { %v754_v18 = vpop.eup %753 }
  0x8c   : > { %v368_v19 = vmul.f32 0.6931472, %v754_v18  ;;  %v398_v20 = vsub.f32 %v390_v14, %v366_v16 }
  0x8e   : > { %v399_v21 = vsub.f32 %v397_v17, %v368_v19  ;;  %v431_v22 = vsub.f32 0.0, %v398_v20 }
  0x90   : > { %v432_v23 = vsub.f32 0.0, %v399_v21 }
  0x92   : > { %v435_v24 = vcombine.low %v431_v22, %v432_v23 }
  0x94   : > { %v442_v26 = vrot.slane %v435_v24, %v1048_v9 }
  0x96   : > { %v449_v28 = vrot.slane %v442_v26, %v1048_v9 }
  0x98   : > { %v451_v29 = vsel %vm1054_vm4, %v449_v28, 0.0 }
  0x99   : > { %v452_v30 = vadd.f32 %v451_v29, %v430_v27 }
  0x9b   : > { %457 = vst.msk [vmem:[#allocation2] sm:$0x3] %vm1040_vm0, %v452_v30 }
  0xa2   : > { %v465_v34 = vld [vmem:[#allocation2] sm:$0x3] }
  0xa3   : > { %v470_v37 = vrot.slane %v465_v34, %v1062_v35  ;;  %v474_v38 = vrot.slane %v465_v34, %v1064_v36 }
  0xa5   : > { %v478_v39 = vsel %vm477_vm6, %v470_v37, 0.0  ;;  %v479_v9 = vsel %vm477_vm6, %v474_v38, 0.0 }
  0xa6   : > { %v480_v41 = vadd.f32 %v479_v9, %v478_v39 }
  0xa8   : > { %481 = vadd.xlane.f32.xlu0 %v480_v41 }
  0xac   : > { %508 = vadd.xlane.f32.xlu0 %v507_v42 }
 0x135   : > { %v482_v1 = vpop.xlane.xlu0 %481 }
 0x136   : > { %v483_v43 = vrot.slane %v482_v1, 4 }
 0x138   : > { %v484_v44 = vadd.f32 %v483_v43, %v482_v1 }
 0x139   : > { %v509_v45 = vpop.xlane.xlu0 %508 }
 0x13a   : > { %v485_v46 = vrot.slane %v484_v44, 2  ;;  %v510_v47 = vrot.slane %v509_v45, 4 }
 0x13c   : > { %v511_v48 = vadd.f32 %v510_v47, %v509_v45  ;;  %v486_v35 = vadd.f32 %v485_v46, %v484_v44 }
 0x13e   : > { %v512_v49 = vrot.slane %v511_v48, 2  ;;  %v487_v36 = vrot.slane %v486_v35, 1 }
 0x140   : > { %v513_v50 = vadd.f32 %v512_v49, %v511_v48  ;;  %v488_v51 = vadd.f32 %v487_v36, %v486_v35 }
 0x142   : > { %680 = vpush %v488_v51  ;;  %v514_v52 = vrot.slane %v513_v50, 1 }
 0x144   : > { %v515_v53 = vadd.f32 %v514_v52, %v513_v50 }
 0x146   : > { %682 = vpush %v515_v53 }
 0x173   : > { %s681_s11 = spop %680 }
 0x174   : > { %v490_v54 = vstv %s681_s11 }
 0x175   : > { %492 = vst.msk [vmem:[%s294_s9] sm:$0x1] %vm491_vm7, %v490_v54 }
 0x177   : > { %s683_s20 = spop %682 }
 0x178   : > { %v517_v55 = vstv %s683_s20 }
 0x179   : > { %518 = vst.msk [vmem:[%s300_s18] sm:$0x1] %vm491_vm7, %v517_v55 }
 0x17a PF: > { %s20_s17 = sadd.s32 1, %s869_s17   ;;  %s1125_s12 = smov %s853_s13 }
 0x17b   : > { %p17_p9 = scmp.ge.s32.totalorder %s20_s17, 4   ;;  %s1126_s13 = smov %s857_s14 }
 0x17c   : > { %s1127_s14 = smov %s946_s24  ;;  %s1128_s15 = smov %s865_s16 }
 0x17d   : > { %s1129_s16 = smov %s1131_s19  ;;  %19 = sbr.rel (!%p17_p9) target bundleno = 6 (0x6), region = 101 }
 0x184   :  { %560 = vsyncpa [#allocation6], 1 }
 0x185   :  { %562 = vsyncpa [#allocation6 + $0x1], 1 }
 0x186   :  { %563 = vsyncpa [#allocation8], 1 }
 0x187   :  { %565 = vsyncpa [#allocation8 + $0x1], 1 }

</bundles_post_ra>
